<compile_context>
chip_gen: v7x
topology: tpu7x:2x2x1
jax: 0.10.0
libtpu: 0.0.40
codegen_flags: <defaults>
</compile_context>

<pallas_src>
import jax
import jax.numpy as jnp
from jax import lax
from jax.experimental import pallas as pl
from jax.experimental.pallas import tpu as pltpu


def _micro_kernel(t_ref, clear_ref, cor_ref, out_ref):
    # Scalar algebra once, on the scalar unit.
    t = t_ref[0]
    omt = 1.0 - t
    const = t * t + omt * omt      # scalar: t^2 + (1-t)^2
    cross = 2.0 * t * omt          # scalar: 2*t*(1-t)

    # Upcast in-kernel so callers may stream bf16 through the DMA.
    clear = clear_ref[...].astype(jnp.float32)   # (TB, D)
    cor = cor_ref[...].astype(jnp.float32)       # (TB, D)

    # Per-row dot product -> (TB, 1): VPU multiply + XLU lane reduction.
    row_dot = jnp.sum(clear * cor, axis=-1, keepdims=True)

    # Exact per-row rsqrt on the EUP (separate bundle slot).
    inv_den = lax.rsqrt(const + cross * row_dot)  # (TB, 1)

    # Fold the normalization into the per-row mix coefficients so the (TB, D)
    # path is just 2 multiplies + 1 add (one fewer full-tile multiply).
    coef_cor = t * inv_den      # (TB, 1)
    coef_clear = omt * inv_den  # (TB, 1)

    out_ref[...] = (coef_cor * cor + coef_clear * clear).astype(out_ref.dtype)


def _pick_row_tile(B, D, max_rows_per_tile):
    """Rows per tile: whole batch if small, else a multiple of 8 sized for VMEM."""
    if B <= max_rows_per_tile:
        return B  # block equals full array dims -> always legal
    # 2 inputs + 1 output, double-buffered, f32 worst case; keep under ~12 MiB
    # so the v5e 16 MiB scoped-VMEM default still has headroom.
    bytes_per_row = 3 * 2 * D * 4
    tb = min(max_rows_per_tile, max(8, (12 * 1024 * 1024) // max(bytes_per_row, 1)))
    tb = max(8, (tb // 8) * 8)  # f32 sublane multiple
    return tb


def micro_forward(feat_clear, feat_cor, t, *, max_rows_per_tile=512):
    """feat_clear, feat_cor: (B, D) arrays (f32 or bf16); t: scalar. Returns (B, D)."""
    B, D = feat_clear.shape
    tb = _pick_row_tile(B, D, max_rows_per_tile)
    grid = (pl.cdiv(B, tb),)

    t_arr = jnp.asarray([t], dtype=jnp.float32)

    return pl.pallas_call(
        _micro_kernel,
        out_shape=jax.ShapeDtypeStruct((B, D), feat_clear.dtype),
        grid=grid,
        in_specs=[
            pl.BlockSpec(memory_space=pltpu.MemorySpace.SMEM),   # t (scalar)
            pl.BlockSpec((tb, D), lambda i: (i, 0)),             # feat_clear tile
            pl.BlockSpec((tb, D), lambda i: (i, 0)),             # feat_cor tile
        ],
        out_specs=pl.BlockSpec((tb, D), lambda i: (i, 0)),
        compiler_params=pltpu.CompilerParams(
            dimension_semantics=("parallel",),
        ),
    )(t_arr, feat_clear, feat_cor)


def _reference(feat_clear, feat_cor, t):
    # Pure-JAX reference replicating the PyTorch per-row loop.
    fc = feat_clear.astype(jnp.float32)
    fr = feat_cor.astype(jnp.float32)
    outs = []
    for i in range(fc.shape[0]):
        num = t * fr[i] + (1 - t) * fc[i]
        den = jnp.sqrt(t ** 2 + (1 - t) ** 2
                       + 2 * t * (1 - t) * jnp.dot(fc[i], fr[i]))
        outs.append(num / den)
    return jnp.stack(outs, axis=0)


def _unit_rows(x):
    # Row-normalize so the denominator is strictly positive (matches the
    # module's intended use on normalized features; avoids NaN-vs-NaN compares).
    return x / jnp.linalg.norm(x, axis=-1, keepdims=True)


if __name__ == "__main__":
    key = jax.random.PRNGKey(0)
    k1, k2, k3, k4 = jax.random.split(key, 4)
    t = 0.3

    # Case 1: small, lane-dense shape (single full-block tile).
    B1, D1 = 8, 128
    fc1 = _unit_rows(jax.random.normal(k1, (B1, D1), dtype=jnp.float32))
    fr1 = _unit_rows(jax.random.normal(k2, (B1, D1), dtype=jnp.float32))
    out1 = micro_forward(fc1, fr1, t)
    jax.block_until_ready(out1)
    ref1 = _reference(fc1, fr1, t)
    assert out1.shape == (B1, D1)
    assert jnp.allclose(out1, ref1, atol=1e-5, rtol=1e-5)

    # Case 2: exercises batch tiling (grid of 3 tiles of 16 rows).
    B2, D2 = 48, 128
    fc2 = _unit_rows(jax.random.normal(k3, (B2, D2), dtype=jnp.float32))
    fr2 = _unit_rows(jax.random.normal(k4, (B2, D2), dtype=jnp.float32))
    out2 = micro_forward(fc2, fr2, t, max_rows_per_tile=16)
    jax.block_until_ready(out2)
    ref2 = _reference(fc2, fr2, t)
    assert out2.shape == (B2, D2)
    assert jnp.allclose(out2, ref2, atol=1e-5, rtol=1e-5)

    # Case 3: bf16 inputs stream through the DMA narrow; compute is f32 in-kernel.
    fc3 = fc2.astype(jnp.bfloat16)
    fr3 = fr2.astype(jnp.bfloat16)
    out3 = micro_forward(fc3, fr3, t)
    jax.block_until_ready(out3)
    ref3 = _reference(fc3, fr3, t)
    assert out3.shape == (B2, D2)
    assert jnp.allclose(out3.astype(jnp.float32), ref3, atol=2e-2, rtol=2e-2)

    print("KERNEL_OK")
</pallas_src>

<mosaic_0001>
module attributes {stable_mosaic.version = 11 : i64} {
  func.func @_micro_kernel(%arg0: i32, %arg1: memref<1xf32, #tpu.memory_space<smem>>, %arg2: memref<8x128xf32, #tpu.memory_space<vmem>>, %arg3: memref<8x128xf32, #tpu.memory_space<vmem>>, %arg4: memref<8x128xf32, #tpu.memory_space<vmem>>) attributes {dimension_semantics = [#tpu.dimension_semantics<parallel>], iteration_bounds = array<i64: 1>, scalar_prefetch = 0 : i64, scratch_operands = 0 : i64, tpu.core_type = #tpu.core_type<tc>, window_params = [{transform_indices = @transform_0, window_bounds = array<i64: 1>}, {transform_indices = @transform_1, window_bounds = array<i64: 8, 128>}, {transform_indices = @transform_2, window_bounds = array<i64: 8, 128>}, {transform_indices = @transform_3, window_bounds = array<i64: 8, 128>}]} {
    %c0 = arith.constant 0 : index
    %0 = memref.load %arg1[%c0] : memref<1xf32, #tpu.memory_space<smem>>
    %cst = arith.constant 1.000000e+00 : f32
    %1 = arith.subf %cst, %0 : f32
    %2 = arith.mulf %0, %0 : f32
    %3 = arith.mulf %1, %1 : f32
    %4 = arith.addf %2, %3 : f32
    %cst_0 = arith.constant 2.000000e+00 : f32
    %5 = arith.mulf %cst_0, %0 : f32
    %6 = arith.mulf %5, %1 : f32
    %c0_1 = arith.constant 0 : index
    %c0_2 = arith.constant 0 : index
    %7 = vector.load %arg2[%c0_1, %c0_2] : memref<8x128xf32, #tpu.memory_space<vmem>>, vector<8x128xf32>
    %c0_3 = arith.constant 0 : index
    %c0_4 = arith.constant 0 : index
    %8 = vector.load %arg3[%c0_3, %c0_4] : memref<8x128xf32, #tpu.memory_space<vmem>>, vector<8x128xf32>
    %9 = arith.mulf %7, %8 : vector<8x128xf32>
    %cst_5 = arith.constant dense<0.000000e+00> : vector<8xf32>
    %10 = vector.multi_reduction <add>, %9, %cst_5 [1] : vector<8x128xf32> to vector<8xf32>
    %11 = vector.shape_cast %10 : vector<8xf32> to vector<8x1xf32>
    %12 = vector.broadcast %6 : f32 to vector<8x1xf32>
    %13 = arith.mulf %12, %11 : vector<8x1xf32>
    %14 = vector.broadcast %4 : f32 to vector<8x1xf32>
    %15 = arith.addf %14, %13 : vector<8x1xf32>
    %16 = math.rsqrt %15 : vector<8x1xf32>
    %17 = vector.broadcast %0 : f32 to vector<8x1xf32>
    %18 = arith.mulf %17, %16 : vector<8x1xf32>
    %19 = vector.broadcast %1 : f32 to vector<8x1xf32>
    %20 = arith.mulf %19, %16 : vector<8x1xf32>
    %21 = vector.broadcast %18 : vector<8x1xf32> to vector<8x128xf32>
    %22 = arith.mulf %21, %8 : vector<8x128xf32>
    %23 = vector.broadcast %20 : vector<8x1xf32> to vector<8x128xf32>
    %24 = arith.mulf %23, %7 : vector<8x128xf32>
    %25 = arith.addf %22, %24 : vector<8x128xf32>
    %c0_6 = arith.constant 0 : index
    %c0_7 = arith.constant 0 : index
    %26 = vector.load %arg4[%c0_6, %c0_7] : memref<8x128xf32, #tpu.memory_space<vmem>>, vector<8x128xf32>
    tpu.vector_store %arg4[%c0_6, %c0_7], %25 {strides = array<i32>} : memref<8x128xf32, #tpu.memory_space<vmem>>, vector<8x128xf32>,
    return
  }
  func.func @transform_0(%arg0: i32) -> i32 {
    %c0_i32 = arith.constant 0 : i32
    %c0_i32_0 = arith.constant 0 : i32
    return %c0_i32 : i32
  }
  func.func @transform_1(%arg0: i32) -> (i32, i32) {
    %c0_i32 = arith.constant 0 : i32
    %c0_i32_0 = arith.constant 0 : i32
    return %arg0, %c0_i32 : i32, i32
  }
  func.func @transform_2(%arg0: i32) -> (i32, i32) {
    %c0_i32 = arith.constant 0 : i32
    %c0_i32_0 = arith.constant 0 : i32
    return %arg0, %c0_i32 : i32, i32
  }
  func.func @transform_3(%arg0: i32) -> (i32, i32) {
    %c0_i32 = arith.constant 0 : i32
    %c0_i32_0 = arith.constant 0 : i32
    return %arg0, %c0_i32 : i32, i32
  }
}

</mosaic_0001>

<bundles_post_ra>
// kernel: tpu_custom_call.1
= control target key start
LH: loop header
LB: loop body
LE: loop exit
PB: predicated region body
PF: predicated region fallthrough
CT: control target
= control target key end

     0   :  { %9 = vsyncpa [#allocation4], 0  ;;  %s230_s0 = inlined_call_operand.<no memory space> [shape: f32[1], index: 0, kind: input, shape index: {}]   ;;  %s231_s1 = inlined_call_operand.hbm [shape: f32[8,128], index: 1, kind: input, shape index: {}]   ;;  %s232_s2 = inlined_call_operand.hbm [shape: f32[8,128], index: 2, kind: input, shape index: {}]   ;;  %s233_s3 = inlined_call_operand.hbm [shape: f32[8,128], index: 3, kind: output, shape index: {}]  }
   0x1   :  { %10 = vsyncpa [#allocation7], 0 }
   0x2   :  { %11 = vsyncpa [#allocation5], 0  ;;  %s158_s12 = smov [#allocation3]   ;;  %s159_s14 = smov [#allocation6]  }
   0x3   :  { %s20_s13 = sshll.u32 %s158_s12, 4  ;;  %s30_s15 = sshll.u32 %s159_s14, 4  ;;  %s21_s13 = int_to_ptr.vmem [resolvable:$true] %s20_s13  ;;  %s31_s15 = int_to_ptr.vmem [resolvable:$true] %s30_s15 }
   0x4   :  { %s86_s18 = scalar_lea.hbm %s231_s1, 128 }
   0x5   :  { %p87_p0 = scmp.ne.s32.totalorder %s231_s1, %s86_s18  ;;  %p90_p1 = scmp.lt.u32.totalorder %s86_s18, %s231_s1 }
   0x7   :  { %p92_p2 = pnand %p90_p1, %p87_p0 }
   0x9   :  { %95 = shalt.err (!%p92_p2)
}
   0xa   :  { %s96_s23 = scalar_lea.vmem %s21_s13, 128  ;;  %p101_p4 = scmp.lt.s32.totalorder %s21_s13, %s21_s13 }
   0xb   :  { %p97_p3 = scmp.ne.s32.totalorder %s21_s13, %s96_s23  ;;  %p102_p5 = scmp.lt.s32.totalorder %s96_s23, %s96_s23 }
   0xd   :  { %p103_p6 = por %p102_p5, %p101_p4 }
   0xf   :  { %p104_p7 = pnand %p103_p6, %p97_p3 }
  0x11   :  { %107 = shalt.err (!%p104_p7)
}
  0x12   :  { %23 = dma.hbm_to_vmem [thread:$0]  %s231_s1, 128, %s21_s13, [#allocation4]  }
  0x13   :  { %s108_s28 = scalar_lea.hbm %s232_s2, 128 }
  0x14   :  { %p109_p8 = scmp.ne.s32.totalorder %s232_s2, %s108_s28  ;;  %p112_p9 = scmp.lt.u32.totalorder %s108_s28, %s232_s2 }
  0x16   :  { %p114_p10 = pnand %p112_p9, %p109_p8 }
  0x18   :  { %117 = shalt.err (!%p114_p10)
}
  0x19   :  { %s118_s6 = scalar_lea.vmem %s31_s15, 128  ;;  %p123_p12 = scmp.lt.s32.totalorder %s31_s15, %s31_s15 }
  0x1a   :  { %p119_p11 = scmp.ne.s32.totalorder %s31_s15, %s118_s6  ;;  %p124_p13 = scmp.lt.s32.totalorder %s118_s6, %s118_s6 }
  0x1c   :  { %p125_p0 = por %p124_p13, %p123_p12 }
  0x1e   :  { %p126_p1 = pnand %p125_p0, %p119_p11 }
  0x20   :  { %129 = shalt.err (!%p126_p1)
}
  0x21   :  { %33 = dma.hbm_to_vmem [thread:$0]  %s232_s2, 128, %s31_s15, [#allocation7]  }
  0x22   :  { %152 = dma.done.wait [#allocation4], 128  }
  0x23   :  { %153 = vsyncadd [#allocation4], 4294967168 }
  0x24   :  { %154 = dma.done.wait [#allocation7], 128  }
  0x25   :  { %155 = vsyncadd [#allocation7], 4294967168  ;;  %v47_v0 = vld [vmem:[#allocation3] sm:$0xff]  ;;  %v48_v1 = vld [vmem:[#allocation6] sm:$0xff]  ;;  %s41_s10 = ssub.f32 1.0, %s230_s0  ;;  %s45_s13 = smul.f32 2.0, %s230_s0  ;;  %v57_v8 = vstv %s230_s0 }
  0x26   :  { %v49_v2 = vmul.f32 %v48_v1, %v47_v0  ;;  %s42_s2 = smul.f32 %s230_s0, %s230_s0  ;;  %s160_s21 = smov [#allocation8]  }
  0x27   :  { %s43_s15 = smul.f32 %s41_s10, %s41_s10  ;;  %v59_v9 = vstv %s41_s10  ;;  %s71_s22 = sshll.u32 %s160_s21, 4  ;;  %s72_s22 = int_to_ptr.vmem [resolvable:$true] %s71_s22 }
  0x28   :  { %50 = vadd.xlane.f32.xlu0 %v49_v2  ;;  %s46_s17 = smul.f32 %s45_s13, %s41_s10  ;;  %s130_s23 = scalar_lea.vmem %s72_s22, 128 }
  0x29   :  { %s44_s18 = sadd.f32 %s43_s15, %s42_s2  ;;  %p131_p2 = scmp.ne.s32.totalorder %s72_s22, %s130_s23 }
  0x2a   :  { %v52_v3 = vstv %s46_s17  ;;  %p135_p3 = scmp.lt.s32.totalorder %s72_s22, %s72_s22  ;;  %p136_p4 = scmp.lt.s32.totalorder %s130_s23, %s130_s23 }
  0x2b   :  { %v54_v5 = vstv %s44_s18 }
  0x2c   :  { %p137_p5 = por %p136_p4, %p135_p3 }
  0x2e   :  { %p138_p6 = pnand %p137_p5, %p131_p2 }
  0xb5   :  { %v51_v4 = vpop.xlane.xlu0 %50 }
  0xb6   :  { %v53_v6 = vmul.f32 %v52_v3, %v51_v4 }
  0xb8   :  { %v55_v7 = vadd.f32 %v54_v5, %v53_v6 }
  0xba   :  { %84 = vrsqrt.f32 %v55_v7 }
  0xc4   :  { %v85_v10 = vpop.eup %84 }
  0xc5   :  { %v58_v11 = vmul.f32 %v85_v10, %v57_v8  ;;  %v60_v12 = vmul.f32 %v85_v10, %v59_v9 }
  0xc7   :  { %v61_v13 = vmul.f32 %v58_v11, %v48_v1  ;;  %v62_v14 = vmul.f32 %v60_v12, %v47_v0 }
  0xc9   :  { %v63_v15 = vadd.f32 %v62_v14, %v61_v13 }
  0xcb   :  { %64 = vst [vmem:[#allocation8] sm:$0xff] %v63_v15 }
  0xcc   :  { %141 = shalt.err (!%p138_p6)
}
  0xcd   :  { %s142_s25 = scalar_lea.hbm %s233_s3, 128 }
  0xce   :  { %p143_p7 = scmp.ne.s32.totalorder %s233_s3, %s142_s25  ;;  %p146_p8 = scmp.lt.u32.totalorder %s142_s25, %s233_s3 }
  0xd0   :  { %p148_p9 = pnand %p146_p8, %p143_p7 }
  0xd2   :  { %151 = shalt.err (!%p148_p9)
}
  0xd3   :  { %74 = dma.vmem_to_hbm [thread:$0]  %s72_s22, 128, %s233_s3, [#allocation5]  }
  0xd4   :  { %156 = dma.done.wait [#allocation5], 128  }
  0xd5   :  { %157 = vsyncadd [#allocation5], 4294967168 }
  0xd6   :  { %78 = vsyncpa [#allocation4], 1 }
  0xd7   :  { %79 = vsyncpa [#allocation7], 1 }
  0xd8   :  { %80 = vsyncpa [#allocation5], 1 }

</bundles_post_ra>
